<compile_context>
chip_gen: v5e
topology: v5e:2x2
jax: 0.10.0
libtpu: 0.0.40
codegen_flags: <defaults>
</compile_context>

<pallas_src>
import functools

import jax
import jax.numpy as jnp
from jax.experimental import pallas as pl
from jax.experimental.pallas import tpu as pltpu


_LANE = 1024            # preferred lane-dense last dim (8 full (8,128) tiles)
_MAX_TILE_ROWS = 2048   # 2048 x 1024 f32 = 8 MiB per tile


def _double_affine_kernel(params_ref, x_ref, o_ref):
    # params_ref (SMEM): [w0, b0, w1, b1]
    w0 = params_ref[0]
    b0 = params_ref[1]
    w1 = params_ref[2]
    b1 = params_ref[3]
    y = x_ref[...] * w0 + b0          # conv  (1x1, 1 -> 1 channel)
    o_ref[...] = y * w1 + b1          # conv1 (x1 == x2 bitwise, stored once)


@functools.partial(jax.jit, donate_argnums=0)
def multiple_forward_model(x_nchw, w0, b0, w1, b1):
    """MultipleForwardModel forward.

    x_nchw: (N, 1, H, W) float32 (donated). w0/b0 and w1/b1 are the scalar
    weight/bias of the two 1x1 single-channel convs (conv.weight[0,0,0,0],
    conv.bias[0], ...).  Returns (x1, x2); both reference the same array.
    """
    orig_shape = x_nchw.shape
    total = x_nchw.size

    params = jnp.stack([w0, b0, w1, b1]).astype(jnp.float32)

    # Exact (pad-free) lane-dense 2-D factorization of the element count.
    if total % _LANE == 0:
        cols = _LANE
    elif total % 128 == 0:
        cols = 128
    else:
        cols = orig_shape[-1]          # always divides total; lane-sparse fallback
    rows = total // cols
    x2d = x_nchw.reshape(rows, cols)   # contiguous reshape -> bitcast, no copy

    # Row tiling: multiple of 8 (or full extent), capped at _MAX_TILE_ROWS,
    # and split into >= 2 grid steps when possible so v7x megacore is used.
    if rows <= 8:
        tile_rows = rows
    else:
        tile_rows = min(_MAX_TILE_ROWS, (rows // 8) * 8)
        if rows >= 16 and pl.cdiv(rows, tile_rows) < 2:
            tile_rows = ((pl.cdiv(rows, 2) + 7) // 8) * 8
    grid = (pl.cdiv(rows, tile_rows),)  # partial final block is masked by Pallas

    blk = pl.BlockSpec((tile_rows, cols), lambda i: (i, 0))

    y2d = pl.pallas_call(
        _double_affine_kernel,
        out_shape=jax.ShapeDtypeStruct((rows, cols), x2d.dtype),
        grid=grid,
        in_specs=[
            pl.BlockSpec(memory_space=pltpu.MemorySpace.SMEM),  # [w0,b0,w1,b1]
            blk,
        ],
        out_specs=blk,
        input_output_aliases={1: 0},     # output reuses x's (donated) buffer
        compiler_params=pltpu.CompilerParams(
            dimension_semantics=("parallel",),
            vmem_limit_bytes=48 * 1024 * 1024,
        ),
        cost_estimate=pl.CostEstimate(
            flops=4 * total,             # two fused mul-adds per element
            transcendentals=0,
            bytes_accessed=2 * 4 * total,  # 1 read + 1 write, f32
        ),
    )(params, x2d)

    y = y2d.reshape(orig_shape)
    # x1 and x2 are bit-identical; returning the same immutable array twice is
    # observationally equivalent to PyTorch's two tensors and saves one full
    # HBM writeback pass.
    return y, y


def _reference(x, w0, b0, w1, b1):
    y = x * w0 + b0
    z1 = y * w1 + b1
    z2 = y * w1 + b1
    return z1, z2


if __name__ == "__main__":
    key = jax.random.PRNGKey(0)
    k_x, k_w0, k_b0, k_w1, k_b1 = jax.random.split(key, 5)

    # 1x1 single-channel conv weight & bias are one scalar each.
    w0 = jax.random.normal(k_w0, (), dtype=jnp.float32)
    b0 = jax.random.normal(k_b0, (), dtype=jnp.float32)
    w1 = jax.random.normal(k_w1, (), dtype=jnp.float32)
    b1 = jax.random.normal(k_b1, (), dtype=jnp.float32)

    # Small NCHW input consistent with Conv2d(1, 1, 1, 1).
    x = jax.random.normal(k_x, (2, 1, 16, 16), dtype=jnp.float32)

    # Compute the reference BEFORE the kernel call: x is donated to the
    # jitted wrapper and must not be used afterwards.
    r1, r2 = _reference(x, w0, b0, w1, b1)

    x1, x2 = multiple_forward_model(x, w0, b0, w1, b1)
    jax.block_until_ready((x1, x2))

    assert x1.shape == r1.shape and x2.shape == r2.shape
    assert jnp.allclose(x1, r1, atol=1e-5, rtol=1e-5)
    assert jnp.allclose(x2, r2, atol=1e-5, rtol=1e-5)

    print("KERNEL_OK")
</pallas_src>

<mosaic_0001>
module attributes {stable_mosaic.version = 11 : i64} {
  func.func @_double_affine_kernel(%arg0: i32, %arg1: memref<4xf32, #tpu.memory_space<smem>>, %arg2: memref<4x128xf32, #tpu.memory_space<vmem>>, %arg3: memref<4x128xf32, #tpu.memory_space<vmem>>) attributes {dimension_semantics = [#tpu.dimension_semantics<parallel>], iteration_bounds = array<i64: 1>, scalar_prefetch = 0 : i64, scratch_operands = 0 : i64, tpu.core_type = #tpu.core_type<tc>, window_params = [{transform_indices = @transform_0, window_bounds = array<i64: 4>}, {transform_indices = @transform_1, window_bounds = array<i64: 4, 128>}, {transform_indices = @transform_2, window_bounds = array<i64: 4, 128>}]} {
    %c0 = arith.constant 0 : index
    %0 = memref.load %arg1[%c0] : memref<4xf32, #tpu.memory_space<smem>>
    %c1 = arith.constant 1 : index
    %1 = memref.load %arg1[%c1] : memref<4xf32, #tpu.memory_space<smem>>
    %c2 = arith.constant 2 : index
    %2 = memref.load %arg1[%c2] : memref<4xf32, #tpu.memory_space<smem>>
    %c3 = arith.constant 3 : index
    %3 = memref.load %arg1[%c3] : memref<4xf32, #tpu.memory_space<smem>>
    %c0_0 = arith.constant 0 : index
    %c0_1 = arith.constant 0 : index
    %4 = vector.load %arg2[%c0_0, %c0_1] : memref<4x128xf32, #tpu.memory_space<vmem>>, vector<4x128xf32>
    %5 = vector.broadcast %0 : f32 to vector<4x128xf32>
    %6 = arith.mulf %4, %5 : vector<4x128xf32>
    %7 = vector.broadcast %1 : f32 to vector<4x128xf32>
    %8 = arith.addf %6, %7 : vector<4x128xf32>
    %9 = vector.broadcast %2 : f32 to vector<4x128xf32>
    %10 = arith.mulf %8, %9 : vector<4x128xf32>
    %11 = vector.broadcast %3 : f32 to vector<4x128xf32>
    %12 = arith.addf %10, %11 : vector<4x128xf32>
    %c0_2 = arith.constant 0 : index
    %c0_3 = arith.constant 0 : index
    %13 = vector.load %arg3[%c0_2, %c0_3] : memref<4x128xf32, #tpu.memory_space<vmem>>, vector<4x128xf32>
    tpu.vector_store %arg3[%c0_2, %c0_3], %12 {strides = array<i32>} : memref<4x128xf32, #tpu.memory_space<vmem>>, vector<4x128xf32>,
    return
  }
  func.func @transform_0(%arg0: i32) -> i32 {
    %c0_i32 = arith.constant 0 : i32
    %c0_i32_0 = arith.constant 0 : i32
    return %c0_i32 : i32
  }
  func.func @transform_1(%arg0: i32) -> (i32, i32) {
    %c0_i32 = arith.constant 0 : i32
    %c0_i32_0 = arith.constant 0 : i32
    return %arg0, %c0_i32 : i32, i32
  }
  func.func @transform_2(%arg0: i32) -> (i32, i32) {
    %c0_i32 = arith.constant 0 : i32
    %c0_i32_0 = arith.constant 0 : i32
    return %arg0, %c0_i32 : i32, i32
  }
}

</mosaic_0001>

<bundles_post_ra>
// kernel: multiple_forward_model.1
= control target key start
LH: loop header
LB: loop body
LE: loop exit
PB: predicated region body
PF: predicated region fallthrough
CT: control target
= control target key end

     0   :  { %7 = vsyncpa [#allocation3], 0  ;;  %s61_s12 = smov [#allocation2]   ;;  %s86_s0 = inlined_call_operand.vmem [shape: f32[4], index: 0, kind: input, shape index: {}]   ;;  %s87_s1 = inlined_call_operand.vmem [shape: f32[4,128], index: 1, kind: input, shape index: {}, may-alias: {1,2}]   ;;  %s88_s2 = inlined_call_operand.vmem [shape: f32[4,128], index: 2, kind: output, shape index: {}, may-alias: {1,2}]  }
   0x1   :  { %s13_s11 = sshll.u32 %s86_s0, 4  ;;  %s14_s11 = int_to_ptr.vmem [resolvable:$true] %s13_s11 }
   0x2   :  { %16 = dma.vmem_to_smem %s14_s11, 16, %s61_s12, [#allocation3]  }
   0x3   :  { %59 = dma.done.wait [#allocation3], 16  }
   0x4   :  { %60 = vsyncadd [#allocation3], 4294967280 }
   0x5   :  { %23 = sfence }
   0x6   :  { %s24_s13 = sld [smem:[#allocation2]]  ;;  %v28_v0 = vld [vmem:[%s87_s1] sm:$0xf] }
   0x7   :  { %s43_s14 = sld [smem:[#allocation2 + $0x1]] }
   0x8   :  { %s44_s15 = sld [smem:[#allocation2 + $0x2]] }
   0x9   :  { %s45_s16 = sld [smem:[#allocation2 + $0x3]] }
   0xc   :  { %v29_v1 = vstv %s24_s13 }
   0xd   :  { %v30_v2 = vmul.f32 %v29_v1, %v28_v0  ;;  %v31_v3 = vstv %s43_s14 }
   0xe   :  { %v33_v4 = vstv %s44_s15 }
   0xf   :  { %v32_v5 = vadd.f32 %v31_v3, %v30_v2  ;;  %v35_v6 = vstv %s45_s16 }
  0x11   :  { %v34_v7 = vmul.f32 %v33_v4, %v32_v5 }
  0x13   :  { %v36_v8 = vadd.f32 %v35_v6, %v34_v7 }
  0x15   :  { %37 = vst [vmem:[%s88_s2] sm:$0xf] %v36_v8 }
  0x16   :  { %42 = vsyncpa [#allocation3], 1 }

</bundles_post_ra>
